<compile_context>
chip_gen: v6e
topology: v6e:2x2x1
jax: 0.10.0
libtpu: 0.0.40
codegen_flags: <defaults>
</compile_context>

<pallas_src>
import functools

import jax
import jax.numpy as jnp
from jax.experimental import pallas as pl
from jax.experimental.pallas import tpu as pltpu

LANE = 128
SUBLANE = 8


# ----------------------------------------------------------------------------
# Fused Pallas kernel: grid = (num_layers, n_row_tiles)
# ----------------------------------------------------------------------------
def fused_gnn_kernel(a_ref, x_ref, w_ref, b_ref, pool_ref, fcw_ref, fcb_ref,
                     o_ref, h_ref, *, out_dim_valid, a_inv_scale):
    l = pl.program_id(0)                  # layer index
    i = pl.program_id(1)                  # A_hat row-tile index
    num_layers = pl.num_programs(0)
    n_row_tiles = pl.num_programs(1)
    tm = a_ref.shape[0]                   # rows per A_hat tile
    n_pad = h_ref.shape[0] // 2           # ping-pong H scratch: [2*n_pad, D]

    wr = jax.lax.rem(l, 2)                # parity of the H half we write
    rd = jax.lax.rem(l + 1, 2)            # parity of the H half we read

    # Seed the layer-0 "previous activations" (== X) once, so that every layer
    # reads uniformly from the ping-pong scratch (no per-layer XW bubble).
    @pl.when(jnp.logical_and(l == 0, i == 0))
    def _seed():
        h_ref[pl.ds(n_pad, n_pad), :] = x_ref[...]

    # ---- (A_tile @ H_prev) @ W_l + b_l, ReLU ---------------------------------
    a_tile = a_ref[...]
    if a_tile.dtype != jnp.bfloat16:      # int8-compressed A: dequant (VPU)
        a_tile = a_tile.astype(jnp.bfloat16)
    h_prev = h_ref[pl.ds(pl.multiple_of(rd * n_pad, tm), n_pad), :]
    msg = jnp.dot(a_tile, h_prev, preferred_element_type=jnp.float32)
    if a_inv_scale != 1.0:                # fold int8 scale into the small result
        msg = msg * a_inv_scale
    z = jnp.dot(msg.astype(jnp.bfloat16), w_ref[0],
                preferred_element_type=jnp.float32)
    act = jnp.maximum(z + b_ref[0], 0.0)
    # TODO(synk): training-mode dropout (p=0.5) not implemented; identity at eval.
    row0 = pl.multiple_of(wr * n_pad + i * tm, tm)
    h_ref[pl.ds(row0, tm), :] = act.astype(h_ref.dtype)

    # ---- head fused into the very last grid step: pool -> fc -> log_softmax --
    @pl.when(jnp.logical_and(l == num_layers - 1, i == n_row_tiles - 1))
    def _head():
        h_last = h_ref[pl.ds(pl.multiple_of(wr * n_pad, tm), n_pad), :]
        pooled = jnp.dot(pool_ref[...], h_last,
                         preferred_element_type=jnp.float32)
        logits = jnp.dot(pooled.astype(jnp.bfloat16), fcw_ref[...],
                         preferred_element_type=jnp.float32) + fcb_ref[...]
        # mask padded output lanes so log_softmax only spans the real classes
        col = jax.lax.broadcasted_iota(jnp.int32, logits.shape, 1)
        logits = jnp.where(col < out_dim_valid, logits, -1e30)
        m = jnp.max(logits, axis=-1, keepdims=True)
        zc = logits - m
        lse = jnp.log(jnp.sum(jnp.exp(zc), axis=-1, keepdims=True))
        o_ref[...] = zc - lse


# ----------------------------------------------------------------------------
# Helpers
# ----------------------------------------------------------------------------
def _round_up(v, m):
    return ((v + m - 1) // m) * m


def _pad2(x, shape):
    pads = [(0, t - s) for s, t in zip(x.shape, shape)]
    return jnp.pad(x, pads)


def _spec(block_shape, index_map, nbuf=None):
    """BlockSpec with an optional explicit buffer count (graceful fallback)."""
    if nbuf is not None and hasattr(pl, "Buffered"):
        try:
            return pl.BlockSpec(block_shape, index_map,
                                pipeline_mode=pl.Buffered(nbuf))
        except TypeError:
            pass
    return pl.BlockSpec(block_shape, index_map)


def _vmem_capacity_bytes():
    try:
        info = pltpu.get_tpu_info()
        cap = int(getattr(info, "vmem_capacity_bytes", 0) or 0)
        if cap > 0:
            return cap
    except Exception:
        pass
    return 128 << 20  # v5e/v6e default


def _plan_tiles(n_pad, d_pad, g_pad, o_pad):
    """Generation-aware VMEM plan: A dtype, A row tile, A buffer depth, limit."""
    cap = _vmem_capacity_bytes()
    # ~100-110 MiB usable on 128-MiB parts (v5e/v6e); ~48 MiB on 64-MiB v7x.
    usable = max(min(cap - (16 << 20), int(cap * 0.85)), 24 << 20)
    headroom = 12 << 20

    fixed = (2 * n_pad * d_pad * 2        # H ping-pong scratch (bf16)
             + 1 * n_pad * d_pad * 2      # X (bf16, Buffered(1))
             + 1 * g_pad * n_pad * 2      # pool (bf16, Buffered(1))
             + 2 * d_pad * d_pad * 2      # W_l (bf16, double buffered)
             + 2 * 1 * d_pad * 4          # b_l (f32, double buffered)
             + 1 * d_pad * o_pad * 2      # fc_w (bf16, Buffered(1))
             + 1 * o_pad * 4              # fc_b (f32, Buffered(1))
             + 2 * g_pad * o_pad * 4)     # output block (f32)
    budget = usable - headroom - fixed

    plan = None
    if n_pad * n_pad * 2 <= budget:            # whole-A residency, bf16
        plan = dict(a_dtype=jnp.bfloat16, a_bytes=2, tm=n_pad, a_buffers=1)
    elif n_pad * n_pad * 1 <= budget:          # whole-A residency, int8
        plan = dict(a_dtype=jnp.int8, a_bytes=1, tm=n_pad, a_buffers=1)
    else:                                      # stream int8 row tiles of A
        for tm in (4096, 2048, 1024, 512, 256, 128):
            if tm < n_pad and n_pad % tm == 0:
                for nbuf in (3, 2):            # deeper pipeline when it fits
                    if nbuf * tm * n_pad <= budget:
                        plan = dict(a_dtype=jnp.int8, a_bytes=1, tm=tm,
                                    a_buffers=nbuf)
                        break
            if plan is not None:
                break
        if plan is None:                       # degenerate fallback
            plan = dict(a_dtype=jnp.int8, a_bytes=1, tm=128, a_buffers=2)

    need = fixed + plan["a_buffers"] * plan["tm"] * n_pad * plan["a_bytes"]
    plan["vmem_limit"] = int(max(min(need + headroom, usable), 16 << 20))
    return plan


def build_norm_adj(edge_list, n_nodes):
    """Dense symmetric-normalized adjacency with self loops (GCNConv norm)."""
    send = edge_list[0]
    recv = edge_list[1]
    a = jnp.zeros((n_nodes, n_nodes), jnp.float32).at[recv, send].add(1.0)
    a = a + jnp.eye(n_nodes, dtype=jnp.float32)
    deg = jnp.sum(a, axis=1)
    dinv = jax.lax.rsqrt(deg)            # deg >= 1 thanks to self loops
    return dinv[:, None] * a * dinv[None, :]


def build_pool_matrix(batch, num_graphs):
    """P[g, i] = 1/|graph g| if batch[i] == g else 0   (global_mean_pool)."""
    one_hot = (batch[None, :] == jnp.arange(num_graphs)[:, None]).astype(jnp.float32)
    counts = jnp.maximum(one_hot.sum(axis=1, keepdims=True), 1.0)
    return one_hot / counts


def init_params(key, num_features, hid_dim, out_dim, num_layers):
    keys = jax.random.split(key, 2 * (num_layers + 1))
    params = {"gcn": []}
    in_dim = num_features
    for layer in range(num_layers):
        kw, kb = keys[2 * layer], keys[2 * layer + 1]
        w = jax.random.normal(kw, (in_dim, hid_dim), jnp.float32) * 0.2
        b = jax.random.normal(kb, (1, hid_dim), jnp.float32) * 0.05
        params["gcn"].append((w, b))
        in_dim = hid_dim
    kw, kb = keys[-2], keys[-1]
    params["fc_w"] = jax.random.normal(kw, (hid_dim, out_dim), jnp.float32) * 0.2
    params["fc_b"] = jax.random.normal(kb, (1, out_dim), jnp.float32) * 0.05
    return params


# ----------------------------------------------------------------------------
# Forward pass
# ----------------------------------------------------------------------------
@functools.partial(jax.jit, static_argnames=("num_graphs",))
def gnn_forward(params, x, edge_list, batch, num_graphs):
    n, num_features = x.shape
    hid = params["gcn"][0][0].shape[1]
    out_dim = params["fc_w"].shape[1]
    num_layers = len(params["gcn"])

    # lane-dense padded dims (n_pad a multiple of 128 so the A columns and the
    # A@H contraction map to full vregs; 256 for large graphs -> tm multiples
    # of 256 for the 256-wide MXU on v6e/v7x)
    n_pad = _round_up(n, 256 if n > 2048 else LANE)
    d_pad = _round_up(max(num_features, hid, LANE), LANE)
    o_pad = _round_up(max(out_dim, LANE), LANE)
    g_pad = _round_up(max(num_graphs, SUBLANE), SUBLANE)

    plan = _plan_tiles(n_pad, d_pad, g_pad, o_pad)
    tm = plan["tm"]
    n_row_tiles = n_pad // tm
    resident = n_row_tiles == 1

    # plain-JAX glue: adjacency / pooling matrices, padding, casts
    a_full = _pad2(build_norm_adj(edge_list, n), (n_pad, n_pad))
    if plan["a_dtype"] == jnp.int8:
        # normalized adjacency values live in [0, 1] -> scale by 127
        a_in = jnp.clip(jnp.round(a_full * 127.0), 0.0, 127.0).astype(jnp.int8)
        a_inv_scale = 1.0 / 127.0
    else:
        a_in = a_full.astype(jnp.bfloat16)
        a_inv_scale = 1.0

    x_p = _pad2(x.astype(jnp.float32), (n_pad, d_pad)).astype(jnp.bfloat16)
    pool = _pad2(build_pool_matrix(batch, num_graphs),
                 (g_pad, n_pad)).astype(jnp.bfloat16)
    w_stack = jnp.stack(
        [_pad2(w, (d_pad, d_pad)) for w, _ in params["gcn"]]).astype(jnp.bfloat16)
    b_stack = jnp.stack(
        [_pad2(b.reshape(1, -1), (1, d_pad)) for _, b in params["gcn"]])
    fc_w = _pad2(params["fc_w"], (d_pad, o_pad)).astype(jnp.bfloat16)
    fc_b = _pad2(params["fc_b"].reshape(1, -1), (1, o_pad)).astype(jnp.float32)

    grid = (num_layers, n_row_tiles)

    # advisory cost estimate for the XLA scheduler
    flops = int(num_layers * (2 * n_pad * n_pad * d_pad + 2 * n_pad * d_pad * d_pad)
                + 2 * g_pad * n_pad * d_pad + 2 * g_pad * d_pad * o_pad)
    a_hbm = n_pad * n_pad * plan["a_bytes"] * (1 if resident else num_layers)
    bytes_accessed = int(a_hbm + x_p.size * 2 + w_stack.size * 2
                         + b_stack.size * 4 + pool.size * 2 + fc_w.size * 2
                         + fc_b.size * 4 + g_pad * o_pad * 4)

    a_index = (lambda l, i: (0, 0)) if resident else (lambda l, i: (i, 0))

    out_pad = pl.pallas_call(
        functools.partial(fused_gnn_kernel, out_dim_valid=out_dim,
                          a_inv_scale=a_inv_scale),
        out_shape=jax.ShapeDtypeStruct((g_pad, o_pad), jnp.float32),
        grid_spec=pltpu.PrefetchScalarGridSpec(
            num_scalar_prefetch=0,
            grid=grid,
            in_specs=[
                _spec((tm, n_pad), a_index, plan["a_buffers"]),        # A_hat
                _spec((n_pad, d_pad), lambda l, i: (0, 0), 1),         # X
                _spec((1, d_pad, d_pad), lambda l, i: (l, 0, 0)),      # W_l
                _spec((1, 1, d_pad), lambda l, i: (l, 0, 0)),          # b_l
                _spec((g_pad, n_pad), lambda l, i: (0, 0), 1),         # pool
                _spec((d_pad, o_pad), lambda l, i: (0, 0), 1),         # fc_w
                _spec((1, o_pad), lambda l, i: (0, 0), 1),             # fc_b
            ],
            out_specs=pl.BlockSpec((g_pad, o_pad), lambda l, i: (0, 0)),
            scratch_shapes=[
                pltpu.VMEM((2 * n_pad, d_pad), jnp.bfloat16),  # ping-pong H
            ]),
        compiler_params=pltpu.CompilerParams(
            dimension_semantics=("arbitrary", "arbitrary"),
            vmem_limit_bytes=plan["vmem_limit"]),
        cost_estimate=pl.CostEstimate(
            flops=flops, transcendentals=int(g_pad * o_pad),
            bytes_accessed=bytes_accessed),
    )(a_in, x_p, w_stack, b_stack, pool, fc_w, fc_b)

    return out_pad[:num_graphs, :out_dim]


# pure-JAX (f32) reference for a tolerance check
def gnn_reference(params, x, edge_list, batch, num_graphs):
    a = build_norm_adj(edge_list, x.shape[0])
    h = x.astype(jnp.float32)
    for w, b in params["gcn"]:
        h = jnp.maximum(a @ (h @ w) + b, 0.0)
    pool = build_pool_matrix(batch, num_graphs)
    logits = pool @ h @ params["fc_w"] + params["fc_b"]
    return jax.nn.log_softmax(logits, axis=-1)


# ----------------------------------------------------------------------------
if __name__ == "__main__":
    num_features = 8
    hid_dim = 32
    out_dim = 4
    num_layers = 5
    n_nodes = 16
    num_graphs = 2

    key = jax.random.PRNGKey(0)
    k_x, k_e, k_p = jax.random.split(key, 3)

    x = jax.random.normal(k_x, (n_nodes, num_features), jnp.float32)

    # Random edges within each graph's node range (graph 0: nodes 0-7,
    # graph 1: nodes 8-15), plus reversed copies to make it undirected.
    e0 = jax.random.randint(k_e, (2, 12), 0, n_nodes // 2)
    e1 = jax.random.randint(jax.random.fold_in(k_e, 1), (2, 12),
                            n_nodes // 2, n_nodes)
    edges = jnp.concatenate([e0, e1], axis=1)
    edge_list = jnp.concatenate([edges, edges[::-1]], axis=1).astype(jnp.int32)

    batch = jnp.concatenate([
        jnp.zeros((n_nodes // 2,), jnp.int32),
        jnp.ones((n_nodes // 2,), jnp.int32),
    ])

    params = init_params(k_p, num_features, hid_dim, out_dim, num_layers)

    out = gnn_forward(params, x, edge_list, batch, num_graphs)
    out = jax.block_until_ready(out)

    assert out.shape == (num_graphs, out_dim)
    # log_softmax rows must exp-sum to 1
    assert jnp.allclose(jnp.exp(out).sum(axis=-1), 1.0, atol=1e-4)
    # tolerance check vs. f32 reference (bf16 MXU path -> loose tolerance)
    ref = gnn_reference(params, x, edge_list, batch, num_graphs)
    max_err = float(jnp.max(jnp.abs(out - ref)))
    assert max_err < 1e-1, f"max |kernel - reference| = {max_err}"
    print("KERNEL_OK")
</pallas_src>

<mosaic_0001>
module attributes {stable_mosaic.version = 11 : i64} {
  func.func private @main(%arg0: i32) attributes {dimension_semantics = [#tpu.dimension_semantics<core_parallel>], iteration_bounds = array<i64: 2>, tpu.core_type = #tpu.core_type<sc_scalar_subcore>, window_params = []} {
    return
  }
}

module attributes {stable_mosaic.version = 11 : i64} {
  func.func private @main(%arg0: i32) attributes {dimension_semantics = [#tpu.dimension_semantics<core_parallel>], iteration_bounds = array<i64: 2>, tpu.core_type = #tpu.core_type<sc_scalar_subcore>, window_params = []} {
    return
  }
}

module attributes {stable_mosaic.version = 11 : i64} {
  func.func @fused_gnn_kernel(%arg0: i32, %arg1: i32, %arg2: memref<128x128xbf16, #tpu.memory_space<vmem>>, %arg3: memref<128x128xbf16, #tpu.memory_space<vmem>>, %arg4: memref<1x128x128xbf16, #tpu.memory_space<vmem>>, %arg5: memref<1x1x128xf32, #tpu.memory_space<vmem>>, %arg6: memref<8x128xbf16, #tpu.memory_space<vmem>>, %arg7: memref<128x128xbf16, #tpu.memory_space<vmem>>, %arg8: memref<1x128xf32, #tpu.memory_space<vmem>>, %arg9: memref<8x128xf32, #tpu.memory_space<vmem>>, %arg10: memref<256x128xbf16, #tpu.memory_space<vmem>>) attributes {dimension_semantics = [#tpu.dimension_semantics<arbitrary>, #tpu.dimension_semantics<arbitrary>], iteration_bounds = array<i64: 5, 1>, scalar_prefetch = 0 : i64, scratch_operands = 1 : i64, tpu.core_type = #tpu.core_type<tc>, window_params = [{pipeline_mode = #tpu.pipeline_mode<synchronous>, transform_indices = @transform_0, window_bounds = array<i64: 128, 128>}, {pipeline_mode = #tpu.pipeline_mode<synchronous>, transform_indices = @transform_1, window_bounds = array<i64: 128, 128>}, {transform_indices = @transform_2, window_bounds = array<i64: 1, 128, 128>}, {transform_indices = @transform_3, window_bounds = array<i64: 1, 1, 128>}, {pipeline_mode = #tpu.pipeline_mode<synchronous>, transform_indices = @transform_4, window_bounds = array<i64: 8, 128>}, {pipeline_mode = #tpu.pipeline_mode<synchronous>, transform_indices = @transform_5, window_bounds = array<i64: 128, 128>}, {pipeline_mode = #tpu.pipeline_mode<synchronous>, transform_indices = @transform_6, window_bounds = array<i64: 1, 128>}, {pipeline_mode = #tpu.pipeline_mode<synchronous>, transform_indices = @transform_7, window_bounds = array<i64: 8, 128>}]} {
    %c2_i32 = arith.constant 2 : i32
    %0 = arith.remsi %arg0, %c2_i32 : i32
    %c1_i32 = arith.constant 1 : i32
    %1 = arith.addi %arg0, %c1_i32 : i32
    %c2_i32_0 = arith.constant 2 : i32
    %2 = arith.remsi %1, %c2_i32_0 : i32
    %c0_i32 = arith.constant 0 : i32
    %3 = arith.cmpi eq, %arg0, %c0_i32 : i32
    %c0_i32_1 = arith.constant 0 : i32
    %4 = arith.cmpi eq, %arg1, %c0_i32_1 : i32
    %5 = arith.andi %3, %4 : i1
    %6 = arith.extui %5 : i1 to i32
    %c0_i32_2 = arith.constant 0 : i32
    %7 = arith.cmpi ne, %6, %c0_i32_2 : i32
    scf.if %7 {
      %c0_18 = arith.constant 0 : index
      %c0_19 = arith.constant 0 : index
      %36 = vector.load %arg3[%c0_18, %c0_19] : memref<128x128xbf16, #tpu.memory_space<vmem>>, vector<128x128xbf16>
      %c128 = arith.constant 128 : index
      %c0_20 = arith.constant 0 : index
      %37 = vector.load %arg10[%c128, %c0_20] : memref<256x128xbf16, #tpu.memory_space<vmem>>, vector<128x128xbf16>
      tpu.vector_store %arg10[%c128, %c0_20], %36 {strides = array<i32>} : memref<256x128xbf16, #tpu.memory_space<vmem>>, vector<128x128xbf16>,
    } else {
    }
    %c0 = arith.constant 0 : index
    %c0_3 = arith.constant 0 : index
    %8 = vector.load %arg2[%c0, %c0_3] : memref<128x128xbf16, #tpu.memory_space<vmem>>, vector<128x128xbf16>
    %c128_i32 = arith.constant 128 : i32
    %9 = arith.muli %2, %c128_i32 : i32
    %10 = tpu.assume_multiple %9, 128 : i32
    %11 = arith.index_cast %10 : i32 to index
    %c0_4 = arith.constant 0 : index
    %12 = vector.load %arg10[%11, %c0_4] : memref<256x128xbf16, #tpu.memory_space<vmem>>, vector<128x128xbf16>
    %cst = arith.constant dense<0.000000e+00> : vector<128x128xf32>
    %13 = tpu.matmul %8, %12, %cst {dimension_numbers = #tpu.dot_dimension_numbers<[1], [0], [0], [1], [0, 0, 1, 1], [], []>} : vector<128x128xbf16>, vector<128x128xbf16>, vector<128x128xf32> -> vector<128x128xf32>
    %14 = arith.truncf %13 : vector<128x128xf32> to vector<128x128xbf16>
    %c0_5 = arith.constant 0 : index
    %c0_6 = arith.constant 0 : index
    %c0_7 = arith.constant 0 : index
    %15 = vector.load %arg4[%c0_5, %c0_6, %c0_7] : memref<1x128x128xbf16, #tpu.memory_space<vmem>>, vector<1x128x128xbf16>
    %16 = vector.shape_cast %15 : vector<1x128x128xbf16> to vector<128x128xbf16>
    %cst_8 = arith.constant dense<0.000000e+00> : vector<128x128xf32>
    %17 = tpu.matmul %14, %16, %cst_8 {dimension_numbers = #tpu.dot_dimension_numbers<[1], [0], [0], [1], [0, 0, 1, 1], [], []>} : vector<128x128xbf16>, vector<128x128xbf16>, vector<128x128xf32> -> vector<128x128xf32>
    %c0_9 = arith.constant 0 : index
    %c0_10 = arith.constant 0 : index
    %c0_11 = arith.constant 0 : index
    %18 = vector.load %arg5[%c0_9, %c0_10, %c0_11] : memref<1x1x128xf32, #tpu.memory_space<vmem>>, vector<1x1x128xf32>
    %19 = vector.shape_cast %18 : vector<1x1x128xf32> to vector<1x128xf32>
    %20 = vector.broadcast %19 : vector<1x128xf32> to vector<128x128xf32>
    %21 = arith.addf %17, %20 : vector<128x128xf32>
    %cst_12 = arith.constant 0.000000e+00 : f32
    %22 = vector.broadcast %cst_12 : f32 to vector<128x128xf32>
    %23 = arith.maximumf %21, %22 : vector<128x128xf32>
    %c128_i32_13 = arith.constant 128 : i32
    %24 = arith.muli %0, %c128_i32_13 : i32
    %c128_i32_14 = arith.constant 128 : i32
    %25 = arith.muli %arg1, %c128_i32_14 : i32
    %26 = arith.addi %24, %25 : i32
    %27 = tpu.assume_multiple %26, 128 : i32
    %28 = arith.truncf %23 : vector<128x128xf32> to vector<128x128xbf16>
    %29 = arith.index_cast %27 : i32 to index
    %c0_15 = arith.constant 0 : index
    %30 = vector.load %arg10[%29, %c0_15] : memref<256x128xbf16, #tpu.memory_space<vmem>>, vector<128x128xbf16>
    tpu.vector_store %arg10[%29, %c0_15], %28 {strides = array<i32>} : memref<256x128xbf16, #tpu.memory_space<vmem>>, vector<128x128xbf16>,
    %c4_i32 = arith.constant 4 : i32
    %31 = arith.cmpi eq, %arg0, %c4_i32 : i32
    %c0_i32_16 = arith.constant 0 : i32
    %32 = arith.cmpi eq, %arg1, %c0_i32_16 : i32
    %33 = arith.andi %31, %32 : i1
    %34 = arith.extui %33 : i1 to i32
    %c0_i32_17 = arith.constant 0 : i32
    %35 = arith.cmpi ne, %34, %c0_i32_17 : i32
    scf.if %35 {
      %c128_i32_18 = arith.constant 128 : i32
      %36 = arith.muli %0, %c128_i32_18 : i32
      %37 = tpu.assume_multiple %36, 128 : i32
      %38 = arith.index_cast %37 : i32 to index
      %c0_19 = arith.constant 0 : index
      %39 = vector.load %arg10[%38, %c0_19] : memref<256x128xbf16, #tpu.memory_space<vmem>>, vector<128x128xbf16>
      %c0_20 = arith.constant 0 : index
      %c0_21 = arith.constant 0 : index
      %40 = vector.load %arg6[%c0_20, %c0_21] : memref<8x128xbf16, #tpu.memory_space<vmem>>, vector<8x128xbf16>
      %cst_22 = arith.constant dense<0.000000e+00> : vector<8x128xf32>
      %41 = tpu.matmul %40, %39, %cst_22 {dimension_numbers = #tpu.dot_dimension_numbers<[1], [0], [0], [1], [0, 0, 1, 1], [], []>} : vector<8x128xbf16>, vector<128x128xbf16>, vector<8x128xf32> -> vector<8x128xf32>
      %42 = arith.truncf %41 : vector<8x128xf32> to vector<8x128xbf16>
      %c0_23 = arith.constant 0 : index
      %c0_24 = arith.constant 0 : index
      %43 = vector.load %arg7[%c0_23, %c0_24] : memref<128x128xbf16, #tpu.memory_space<vmem>>, vector<128x128xbf16>
      %cst_25 = arith.constant dense<0.000000e+00> : vector<8x128xf32>
      %44 = tpu.matmul %42, %43, %cst_25 {dimension_numbers = #tpu.dot_dimension_numbers<[1], [0], [0], [1], [0, 0, 1, 1], [], []>} : vector<8x128xbf16>, vector<128x128xbf16>, vector<8x128xf32> -> vector<8x128xf32>
      %c0_26 = arith.constant 0 : index
      %c0_27 = arith.constant 0 : index
      %45 = vector.load %arg8[%c0_26, %c0_27] : memref<1x128xf32, #tpu.memory_space<vmem>>, vector<1x128xf32>
      %46 = vector.broadcast %45 : vector<1x128xf32> to vector<8x128xf32>
      %47 = arith.addf %44, %46 : vector<8x128xf32>
      %48 = tpu.iota {dimensions = array<i32: 1>} : vector<8x128xi32>
      %c4_i32_28 = arith.constant 4 : i32
      %49 = vector.broadcast %c4_i32_28 : i32 to vector<8x128xi32>
      %50 = arith.cmpi slt, %48, %49 : vector<8x128xi32>
      %cst_29 = arith.constant -1.000000e+30 : f32
      %51 = vector.broadcast %cst_29 : f32 to vector<8x128xf32>
      %52 = arith.select %50, %47, %51 : vector<8x128xi1>, vector<8x128xf32>
      %cst_30 = arith.constant dense<0xFF800000> : vector<8xf32>
      %53 = vector.multi_reduction <maximumf>, %52, %cst_30 [1] : vector<8x128xf32> to vector<8xf32>
      %54 = vector.shape_cast %53 : vector<8xf32> to vector<8x1xf32>
      %55 = vector.broadcast %54 : vector<8x1xf32> to vector<8x128xf32>
      %56 = arith.subf %52, %55 : vector<8x128xf32>
      %57 = math.exp %56 : vector<8x128xf32>
      %cst_31 = arith.constant dense<0.000000e+00> : vector<8xf32>
      %58 = vector.multi_reduction <add>, %57, %cst_31 [1] : vector<8x128xf32> to vector<8xf32>
      %59 = vector.shape_cast %58 : vector<8xf32> to vector<8x1xf32>
      %60 = math.log %59 : vector<8x1xf32>
      %61 = vector.broadcast %60 : vector<8x1xf32> to vector<8x128xf32>
      %62 = arith.subf %56, %61 : vector<8x128xf32>
      %c0_32 = arith.constant 0 : index
      %c0_33 = arith.constant 0 : index
      %63 = vector.load %arg9[%c0_32, %c0_33] : memref<8x128xf32, #tpu.memory_space<vmem>>, vector<8x128xf32>
      tpu.vector_store %arg9[%c0_32, %c0_33], %62 {strides = array<i32>} : memref<8x128xf32, #tpu.memory_space<vmem>>, vector<8x128xf32>,
    } else {
    }
    return
  }
  func.func @transform_0(%arg0: i32, %arg1: i32) -> (i32, i32) {
    %c0_i32 = arith.constant 0 : i32
    %c0_i32_0 = arith.constant 0 : i32
    %c0_i32_1 = arith.constant 0 : i32
    return %c0_i32, %c0_i32_0 : i32, i32
  }
  func.func @transform_1(%arg0: i32, %arg1: i32) -> (i32, i32) {
    %c0_i32 = arith.constant 0 : i32
    %c0_i32_0 = arith.constant 0 : i32
    %c0_i32_1 = arith.constant 0 : i32
    return %c0_i32, %c0_i32_0 : i32, i32
  }
  func.func @transform_2(%arg0: i32, %arg1: i32) -> (i32, i32, i32) {
    %c0_i32 = arith.constant 0 : i32
    %c0_i32_0 = arith.constant 0 : i32
    %c0_i32_1 = arith.constant 0 : i32
    return %arg0, %c0_i32, %c0_i32_0 : i32, i32, i32
  }
  func.func @transform_3(%arg0: i32, %arg1: i32) -> (i32, i32, i32) {
    %c0_i32 = arith.constant 0 : i32
    %c0_i32_0 = arith.constant 0 : i32
    %c0_i32_1 = arith.constant 0 : i32
    return %arg0, %c0_i32, %c0_i32_0 : i32, i32, i32
  }
  func.func @transform_4(%arg0: i32, %arg1: i32) -> (i32, i32) {
    %c0_i32 = arith.constant 0 : i32
    %c0_i32_0 = arith.constant 0 : i32
    %c0_i32_1 = arith.constant 0 : i32
    return %c0_i32, %c0_i32_0 : i32, i32
  }
  func.func @transform_5(%arg0: i32, %arg1: i32) -> (i32, i32) {
    %c0_i32 = arith.constant 0 : i32
    %c0_i32_0 = arith.constant 0 : i32
    %c0_i32_1 = arith.constant 0 : i32
    return %c0_i32, %c0_i32_0 : i32, i32
  }
  func.func @transform_6(%arg0: i32, %arg1: i32) -> (i32, i32) {
    %c0_i32 = arith.constant 0 : i32
    %c0_i32_0 = arith.constant 0 : i32
    %c0_i32_1 = arith.constant 0 : i32
    return %c0_i32, %c0_i32_0 : i32, i32
  }
  func.func @transform_7(%arg0: i32, %arg1: i32) -> (i32, i32) {
    %c0_i32 = arith.constant 0 : i32
    %c0_i32_0 = arith.constant 0 : i32
    %c0_i32_1 = arith.constant 0 : i32
    return %c0_i32, %c0_i32_0 : i32, i32
  }
}

</mosaic_0001>

<bundles_post_ra>
// kernel: gnn_forward.1
= control target key start
LH: loop header
LB: loop body
LE: loop exit
PB: predicated region body
PF: predicated region fallthrough
CT: control target
= control target key end

     0   :  { %s1574_s24 = smov 0   ;;  %s1576_s25 = smov 0   ;;  %s1750_s0 = inlined_call_operand.vmem [shape: bf16[128,128], index: 0, kind: input, shape index: {}]   ;;  %s1751_s1 = inlined_call_operand.vmem [shape: bf16[128,128], index: 1, kind: input, shape index: {}]   ;;  %s1752_s2 = inlined_call_operand.vmem [shape: bf16[5,128,128], index: 2, kind: input, shape index: {}]   ;;  %s1753_s3 = inlined_call_operand.vmem [shape: f32[5,1,128], index: 3, kind: input, shape index: {}]   ;;  %s1754_s4 = inlined_call_operand.vmem [shape: bf16[8,128], index: 4, kind: input, shape index: {}]   ;;  %s1755_s5 = inlined_call_operand.vmem [shape: bf16[128,128], index: 5, kind: input, shape index: {}]   ;;  %s1756_s6 = inlined_call_operand.vmem [shape: f32[1,128], index: 6, kind: input, shape index: {}]   ;;  %s1757_s7 = inlined_call_operand.vmem [shape: f32[8,128], index: 7, kind: output, shape index: {}]  }
   0x1   :  { %s1578_s26 = smov 0  }
   0x2 LB: > { %s29_s27 = sadd.s32 1, %s1526_s25  ;;  %p1146_p0 = scmp.ge.s32.totalorder %s1530_s26, 1  ;;  %s1530_s26 = sphi %s1578_s26, %s17_s26   ;;  %s1526_s25 = sphi %s1576_s25, %s1759_s25   ;;  %s1522_s24 = sphi %s1574_s24, %s1758_s24  }
   0x3   : > { %p31_p1 = scmp.ge.s32.totalorder %s29_s27, 5  ;;  %p252_p2 = scmp.lt.s32.totalorder %s1530_s26, 6 }
   0x5   : > { %s1761_s27 = smov (%p31_p1, %s29_s27), 0  ;;  %p253_p3 = pnand %p1146_p0, %p252_p2 }
   0x6   : > { %p282_p4 = scmp.lt.s32.totalorder (!%p253_p3), %s1522_s24, 4  ;;  %p291_p5 = scmp.lt.s32.totalorder (!%p253_p3), %s1522_s24, 0 }
   0x7   : > { %256 = sbr.rel (%p253_p3) target bundleno = 1230 (0x4ce), region = 48  ;;  %s292_s28 = ssub.s32 (!%p253_p3), 0, %s1522_s24 }
   0x8   : > { %s297_s29 = sadd.s32 (!%p253_p3), 1, %s1522_s24  ;;  %s1149_s8 = smin.u32 (!%p253_p3), %s1522_s24, %s292_s28 }
   0x9   : > { %p298_p6 = scmp.lt.s32.totalorder (!%p253_p3), %s297_s29, 0  ;;  %s294_s16 = sand.u32 (!%p253_p3), 1, %s1149_s8  }
   0xa   : > { %s295_s17 = ssub.s32 (!%p253_p3), 0, %s294_s16  ;;  %s299_s18 = ssub.s32 (!%p253_p3), 0, %s297_s29 }
   0xb   : > { %s1150_s19 = smin.u32 (!%p253_p3), %s299_s18, %s297_s29  ;;  %p304_p7 = scmp.eq.s32.totalorder (!%p253_p3), %s1522_s24, 0 }
   0xc   : > { %s1599_s30 = scalar_select %p282_p4, %s1522_s24, 4  ;;  %v310_v0 = vld [vmem:[%s1751_s1] sm:$0xff] (%p304_p7)   ;;  %v312_v1 = vld [vmem:[%s1751_s1 + $0x8] sm:$0xff] (%p304_p7)   ;;  %v314_v2 = vld [vmem:[%s1751_s1 + $0x10] sm:$0xff] (%p304_p7)  }
   0xd   : > { %s1763_s17 = smov (!%p291_p5, %s295_s17), %s294_s16  ;;  %s301_s20 = sand.u32 1, %s1150_s19   ;;  %326 = vst [vmem:[#allocation2 + $0x40] sm:$0xff] (%p304_p7), %v310_v0   ;;  %328 = vst [vmem:[#allocation2 + $0x48] sm:$0xff] (%p304_p7), %v312_v1   ;;  %v316_v3 = vld [vmem:[%s1751_s1 + $0x18] sm:$0xff] (%p304_p7)   ;;  %v318_v4 = vld [vmem:[%s1751_s1 + $0x20] sm:$0xff] (%p304_p7)  }
   0xe   : > { %s1218_s9 = sshll.u32 %s1599_s30, 6  ;;  %s289_s12 = scalar_lea.vmem %s1753_s3, %s1599_s30  ;;  %330 = vst [vmem:[#allocation2 + $0x50] sm:$0xff] (%p304_p7), %v314_v2   ;;  %v320_v5 = vld [vmem:[%s1751_s1 + $0x28] sm:$0xff] (%p304_p7)   ;;  %332 = vst [vmem:[#allocation2 + $0x58] sm:$0xff] (%p304_p7), %v316_v3   ;;  %v322_v6 = vld [vmem:[%s1751_s1 + $0x30] sm:$0xff] (%p304_p7)  }
   0xf   : > { %s1610_s15 = scalar_lea.vmem %s1752_s2, %s1218_s9  ;;  %s302_s21 = ssub.s32 0, %s301_s20  ;;  %334 = vst [vmem:[#allocation2 + $0x60] sm:$0xff] (%p304_p7), %v318_v4   ;;  %336 = vst [vmem:[#allocation2 + $0x68] sm:$0xff] (%p304_p7), %v320_v5   ;;  %v324_v7 = vld [vmem:[%s1751_s1 + $0x38] sm:$0xff] (%p304_p7)  }
  0x10   : > { %s1765_s21 = smov (!%p298_p6, %s302_s21), %s301_s20  ;;  %309 = sbr.rel (!%p304_p7) target bundleno = 21 (0x15), region = 52  ;;  %338 = vst [vmem:[#allocation2 + $0x70] sm:$0xff] (%p304_p7), %v322_v6   ;;  %340 = vst [vmem:[#allocation2 + $0x78] sm:$0xff] (%p304_p7), %v324_v7  }
  0x15 PF: > { %s1152_s28 = sshll.u32 %s1765_s21, 7  ;;  %v1472_v8 = vld [vmem:[%s1750_s0] sm:$0xff]   ;;  %v1480_v14 = vld [vmem:[%s1610_s15 + $0x38] sm:$0xff]   ;;  %v1481_v15 = vld [vmem:[%s1610_s15 + $0x30] sm:$0xff]   ;;  %p851_p8 = scmp.eq.s32.totalorder %s1522_s24, 4 }
  0x16   : > { %s359_s8 = sshra.s32 %s1152_s28, 3  ;;  %1350 = vmatprep.mubr.bf16.mxu0 %v1472_v8  ;;  %1366 = vmatprep.subr.bf16.mxu1 %v1480_v14  ;;  %v1482_v17 = vld [vmem:[%s1610_s15 + $0x28] sm:$0xff]   ;;  %v1483_v19 = vld [vmem:[%s1610_s15 + $0x20] sm:$0xff]   ;;  %v1484_v21 = vld [vmem:[%s1610_s15 + $0x18] sm:$0xff]   ;;  %vm1533_vm0 = vmmov (%p851_p8), 0  }
  0x17   : > { %s1153_s29 = sshll.u32 %s359_s8, 2  ;;  %1367 = vmatpush3.bf16.msra.mxu1 %v1480_v14  ;;  %v1485_v22 = vld [vmem:[%s1610_s15 + $0x10] sm:$0xff]   ;;  %v1473_v23 = vld [vmem:[%s1750_s0 + $0x8] sm:$0xff]   ;;  %v1475_v25 = vld [vmem:[%s1750_s0 + $0x18] sm:$0xff]  }
  0x18   : > { %s1642_s11 = scalar_lea.vmem [#allocation2], %s1153_s29  ;;  %1368 = vmatprep.subr.bf16.mxu1 %v1481_v15  ;;  %v1474_v24 = vld [vmem:[%s1750_s0 + $0x10] sm:$0xff]   ;;  %v1476_v26 = vld [vmem:[%s1750_s0 + $0x20] sm:$0xff]   ;;  %v1477_v27 = vld [vmem:[%s1750_s0 + $0x28] sm:$0xff]  }
  0x19   : > { %v1464_v9 = vld [vmem:[%s1642_s11 + $0x38] sm:$0xff]   ;;  %v1465_v10 = vld [vmem:[%s1642_s11 + $0x30] sm:$0xff]   ;;  %v1466_v11 = vld [vmem:[%s1642_s11 + $0x28] sm:$0xff]  }
  0x1a   : > { %1334 = vmatprep.subr.bf16.mxu0 %v1464_v9  ;;  %v1467_v12 = vld [vmem:[%s1642_s11 + $0x20] sm:$0xff]   ;;  %v1468_v13 = vld [vmem:[%s1642_s11 + $0x18] sm:$0xff]   ;;  %v1469_v16 = vld [vmem:[%s1642_s11 + $0x10] sm:$0xff]  }
  0x1b   : > { %1335 = vmatpush3.bf16.msra.mxu0 %v1464_v9  ;;  %1369 = vmatpush3.bf16.msra.mxu1 %v1481_v15  ;;  %v1470_v18 = vld [vmem:[%s1642_s11 + $0x8] sm:$0xff]   ;;  %v1471_v20 = vld [vmem:[%s1642_s11] sm:$0xff]   ;;  %v1478_v28 = vld [vmem:[%s1750_s0 + $0x30] sm:$0xff]  }
  0x1c   : > { %1336 = vmatprep.subr.bf16.mxu0 %v1465_v10  ;;  %1370 = vmatprep.subr.bf16.mxu1 %v1482_v17  ;;  %v1479_v29 = vld [vmem:[%s1750_s0 + $0x38] sm:$0xff]   ;;  %v1486_v30 = vld [vmem:[%s1610_s15 + $0x8] sm:$0xff]   ;;  %v1487_v31 = vld [vmem:[%s1610_s15] sm:$0xff]   ;;  %s1179_s15 = sshll.u32 %s1763_s17, 7 }
  0x1d   : > { %v1170_v57 = vld [vmem:[%s289_s12] ss:$0 sm:$0xff]  ;;  %s831_s13 = sshra.s32 %s1179_s15, 3 }
  0x1e   : > { %s1196_s14 = sshll.u32 %s831_s13, 2 }
  0x1f   : > { %1337 = vmatpush3.bf16.msra.mxu0 %v1465_v10  ;;  %1371 = vmatpush3.bf16.msra.mxu1 %v1482_v17  ;;  %s1688_s17 = scalar_lea.vmem [#allocation2], %s1196_s14 }
  0x20   : > { %1338 = vmatprep.subr.bf16.mxu0 %v1466_v11  ;;  %1372 = vmatprep.subr.bf16.mxu1 %v1483_v19 }
  0x23   : > { %1339 = vmatpush3.bf16.msra.mxu0 %v1466_v11  ;;  %1373 = vmatpush3.bf16.msra.mxu1 %v1483_v19 }
  0x24   : > { %1340 = vmatprep.subr.bf16.mxu0 %v1467_v12  ;;  %1374 = vmatprep.subr.bf16.mxu1 %v1484_v21 }
  0x27   : > { %1341 = vmatpush3.bf16.msra.mxu0 %v1467_v12  ;;  %1375 = vmatpush3.bf16.msra.mxu1 %v1484_v21 }
  0x28   : > { %1342 = vmatprep.subr.bf16.mxu0 %v1468_v13  ;;  %1376 = vmatprep.subr.bf16.mxu1 %v1485_v22 }
  0x2b   : > { %1343 = vmatpush3.bf16.msra.mxu0 %v1468_v13  ;;  %1377 = vmatpush3.bf16.msra.mxu1 %v1485_v22 }
  0x2c   : > { %1344 = vmatprep.subr.bf16.mxu0 %v1469_v16  ;;  %1378 = vmatprep.subr.bf16.mxu1 %v1486_v30 }
  0x2f   : > { %1345 = vmatpush3.bf16.msra.mxu0 %v1469_v16  ;;  %1379 = vmatpush3.bf16.msra.mxu1 %v1486_v30 }
  0x30   : > { %1346 = vmatprep.subr.bf16.mxu0 %v1470_v18  ;;  %1380 = vmatprep.subr.bf16.mxu1 %v1487_v31 }
  0x33   : > { %1347 = vmatpush3.bf16.msra.mxu0 %v1470_v18  ;;  %1381 = vmatpush3.bf16.msra.mxu1 %v1487_v31 }
  0x34   : > { %1348 = vmatprep.subr.bf16.mxu0 %v1471_v20 }
  0x37   : > { %1349 = vmatpush3.bf16.msra.mxu0 %v1471_v20 }
  0x3a   : > { %1351 = vmatmul.mubr.bf16.vlgmr.msra.gmra.mxu0 %v1473_v23 }
  0x3b   : > { %1354 = vmatprep.mubr.bf16.mxu0 %v1474_v24 }
  0x42   : > { %1355 = vmatmul.mubr.bf16.gmra.mxu0 %v1475_v25 }
  0x43   : > { %1358 = vmatprep.mubr.bf16.mxu0 %v1476_v26 }
  0x4a   : > { %1359 = vmatmul.mubr.bf16.gmra.mxu0 %v1477_v27 }
  0x4b   : > { %1362 = vmatprep.mubr.bf16.mxu0 %v1478_v28 }
  0x52   : > { %1363 = vmatmul.mubr.bf16.gmra.mxu0 %v1479_v29 }
  0xfa   : > { %v1352_v32 = vpop.f32.mrf.mxu0 }
  0xfc   : > { %v509_v33 = vpop.f32.mrf.mxu0 }
  0xfe   : > { %v1353_v34 = vpop.f32.mrf.mxu0 }
  0xff   : > { %v573_v37 = vpack.c.bf16 %v1353_v34, %v1352_v32 }
 0x100   : > { %v512_v35 = vpop.f32.mrf.mxu0 }
 0x101   : > { %v572_v36 = vpack.c.bf16 %v512_v35, %v509_v33 }
 0x102   : > { %v1356_v38 = vpop.f32.mrf.mxu0 }
 0x103   : > { %1382 = vmatprep.mubr.bf16.mxu1 %v572_v36 }
 0x104   : > { %v525_v39 = vpop.f32.mrf.mxu0  ;;  %1383 = vmatmul.mubr.bf16.vlgmr.msra.gmra.mxu1 %v573_v37 }
 0x106   : > { %v1357_v40 = vpop.f32.mrf.mxu0 }
 0x107   : > { %v575_v43 = vpack.c.bf16 %v1357_v40, %v1356_v38 }
 0x108   : > { %v528_v41 = vpop.f32.mrf.mxu0 }
 0x109   : > { %v574_v42 = vpack.c.bf16 %v528_v41, %v525_v39 }
 0x10a   : > { %v1360_v44 = vpop.f32.mrf.mxu0 }
 0x10b   : > { %1386 = vmatprep.mubr.bf16.mxu1 %v574_v42 }
 0x10c   : > { %v541_v45 = vpop.f32.mrf.mxu0  ;;  %1387 = vmatmul.mubr.bf16.gmra.mxu1 %v575_v43 }
 0x10e   : > { %v1361_v46 = vpop.f32.mrf.mxu0 }
 0x10f   : > { %v577_v49 = vpack.c.bf16 %v1361_v46, %v1360_v44 }
 0x110   : > { %v544_v47 = vpop.f32.mrf.mxu0 }
 0x111   : > { %v576_v48 = vpack.c.bf16 %v544_v47, %v541_v45 }
 0x112   : > { %v1364_v50 = vpop.f32.mrf.mxu0 }
 0x113   : > { %1390 = vmatprep.mubr.bf16.mxu1 %v576_v48 }
 0x114   : > { %v557_v51 = vpop.f32.mrf.mxu0  ;;  %1391 = vmatmul.mubr.bf16.gmra.mxu1 %v577_v49 }
 0x116   : > { %v1365_v52 = vpop.f32.mrf.mxu0 }
 0x117   : > { %v579_v55 = vpack.c.bf16 %v1365_v52, %v1364_v50  ;;  %v1532_v50 = vmov (%p851_p8), 0.0  }
 0x118   : > { %v560_v53 = vpop.f32.mrf.mxu0  ;;  %1398 = vmatprep.subr.bf16.mxu0 (%p851_p8), %v1532_v50  ;;  %1418 = vmatprep.subr.bf16.mxu1 (%p851_p8), %v1532_v50 }
 0x119   : > { %v578_v54 = vpack.c.bf16 %v560_v53, %v557_v51  ;;  %1414 = vmatprep.mubr.msk.bf16.mxu0 (%p851_p8), %vm1533_vm0, %v1532_v50  ;;  %v1496_v53 = vld [vmem:[%s1755_s5 + $0x38] sm:$0xff] (%p851_p8)  }
 0x11a   : > { %1419 = vmatpush3.bf16.msra.mxu1 (%p851_p8), %v1496_v53 }
 0x11b   : > { %1394 = vmatprep.mubr.bf16.mxu1 %v578_v54  ;;  %1420 = vmatprep.subr.bf16.mxu1 (%p851_p8), %v1532_v50 }
 0x11c   : > { %1395 = vmatmul.mubr.bf16.gmra.mxu1 %v579_v55  ;;  %v1497_v55 = vld [vmem:[%s1755_s5 + $0x30] sm:$0xff] (%p851_p8)  }
 0x11d   : > { %1434 = vmatprep.mubr.msk.bf16.mxu1 (%p851_p8), %vm1533_vm0, %v1532_v50 }
 0x11e   : > { %1421 = vmatpush3.bf16.msra.mxu1 (%p851_p8), %v1497_v55 }
 0x11f   : > { %1422 = vmatprep.subr.bf16.mxu1 (%p851_p8), %v1532_v50 }
 0x1c4   : > { %v1384_v56 = vpop.f32.mrf.mxu1 }
 0x1c5   : > { %v694_v59 = vadd.f32 %v1384_v56, %v1170_v57 }
 0x1c6   : > { %v685_v58 = vpop.f32.mrf.mxu1 }
 0x1c7   : > { %v686_v61 = vadd.f32 %v1170_v57, %v685_v58  ;;  %v750_v0 = vmax.f32 %v694_v59, 0.0  ;;  %v1499_v59 = vld [vmem:[%s1755_s5 + $0x20] sm:$0xff] (%p851_p8)  }
 0x1c8   : > { %v1385_v60 = vpop.f32.mrf.mxu1 }
 0x1c9   : > { %v697_v62 = vadd.f32 %v1385_v60, %v1170_v57  ;;  %v748_v4 = vmax.f32 %v686_v61, 0.0  ;;  %v1500_v61 = vld [vmem:[%s1755_s5 + $0x18] sm:$0xff] (%p851_p8)  }
 0x1ca   : > { %v688_v63 = vpop.f32.mrf.mxu1 }
 0x1cb   : > { %v751_v1 = vmax.f32 %v697_v62, 0.0  ;;  %v689_v2 = vadd.f32 %v1170_v57, %v688_v63  ;;  %v1501_v63 = vld [vmem:[%s1755_s5 + $0x10] sm:$0xff] (%p851_p8)  }
 0x1cc   : > { %v1388_v3 = vpop.f32.mrf.mxu1 }
 0x1cd   : > { %v1245_v5 = vpack.c.bf16 %v751_v1, %v750_v0  ;;  %v749_v6 = vmax.f32 %v689_v2, 0.0  ;;  %v710_v9 = vadd.f32 %v1388_v3, %v1170_v57  ;;  %v876_v0 = vld [vmem:[%s1754_s4] sm:$0xf] (%p851_p8)  ;;  %v1502_v1 = vld [vmem:[%s1755_s5 + $0x8] sm:$0xff] (%p851_p8)  }
 0x1ce   : > { %v701_v7 = vpop.f32.mrf.mxu1  ;;  %v1503_v2 = vld [vmem:[%s1755_s5] sm:$0xff] (%p851_p8)  }
 0x1cf   : > { %1277 = vst [vmem:[%s1688_s17 + $0x8] sm:$0xff] %v1245_v5   ;;  %v1240_v8 = vpack.c.bf16 %v749_v6, %v748_v4  ;;  %v702_v11 = vadd.f32 %v1170_v57, %v701_v7  ;;  %v754_v14 = vmax.f32 %v710_v9, 0.0 }
 0x1d0   : > { %v1389_v10 = vpop.f32.mrf.mxu1 }
 0x1d1   : > { %1241 = vst [vmem:[%s1688_s17] sm:$0xff] %v1240_v8   ;;  %v713_v12 = vadd.f32 %v1389_v10, %v1170_v57  ;;  %v752_v18 = vmax.f32 %v702_v11, 0.0  ;;  %v1077_v8 = vlaneseq (%p851_p8)  ;;  %v1207_v10 = vld [vmem:[%s1756_s6] ss:$0 sm:$0xff] (%p851_p8) }
 0x1d2   : > { %v704_v13 = vpop.f32.mrf.mxu1 }
 0x1d3   : > { %v755_v15 = vmax.f32 %v713_v12, 0.0  ;;  %v705_v16 = vadd.f32 %v1170_v57, %v704_v13  ;;  %v1078_v9 = vand.u32 (%p851_p8), 127, %v1077_v8 }
 0x1d4   : > { %v1392_v17 = vpop.f32.mrf.mxu1 }
 0x1d5   : > { %v1255_v19 = vpack.c.bf16 %v755_v15, %v754_v14  ;;  %v753_v20 = vmax.f32 %v705_v16, 0.0  ;;  %v726_v23 = vadd.f32 %v1392_v17, %v1170_v57  ;;  %vm1079_vm1 = vcmp.lt.s32.totalorder (%p851_p8), %v1078_v9, 4 }
 0x1d6   : > { %v717_v21 = vpop.f32.mrf.mxu1  ;;  %v1494_v60 = vld [vmem:[%s1688_s17 + $0x8] sm:$0xff] (%p851_p8)  }
 0x1d7   : > { %1279 = vst [vmem:[%s1688_s17 + $0x18] sm:$0xff] %v1255_v19   ;;  %v1250_v22 = vpack.c.bf16 %v753_v20, %v752_v18  ;;  %v718_v25 = vadd.f32 %v1170_v57, %v717_v21  ;;  %v758_v28 = vmax.f32 %v726_v23, 0.0 }
 0x1d8   : > { %v1393_v24 = vpop.f32.mrf.mxu1  ;;  %v1495_v62 = vld [vmem:[%s1688_s17] sm:$0xff] (%p851_p8)  }
 0x1d9   : > { %1278 = vst [vmem:[%s1688_s17 + $0x10] sm:$0xff] %v1250_v22   ;;  %v729_v26 = vadd.f32 %v1393_v24, %v1170_v57  ;;  %v756_v32 = vmax.f32 %v718_v25, 0.0 }
 0x1da   : > { %v720_v27 = vpop.f32.mrf.mxu1 }
 0x1db   : > { %v759_v29 = vmax.f32 %v729_v26, 0.0  ;;  %v721_v30 = vadd.f32 %v1170_v57, %v720_v27 }
 0x1dc   : > { %v1396_v31 = vpop.f32.mrf.mxu1 }
 0x1dd   : > { %v1265_v33 = vpack.c.bf16 %v759_v29, %v758_v28  ;;  %v757_v34 = vmax.f32 %v721_v30, 0.0  ;;  %v742_v37 = vadd.f32 %v1396_v31, %v1170_v57 }
 0x1de   : > { %v733_v35 = vpop.f32.mrf.mxu1  ;;  %v1492_v56 = vld [vmem:[%s1688_s17 + $0x18] sm:$0xff] (%p851_p8)  }
 0x1df   : > { %1281 = vst [vmem:[%s1688_s17 + $0x28] sm:$0xff] %v1265_v33   ;;  %v1260_v36 = vpack.c.bf16 %v757_v34, %v756_v32  ;;  %v734_v39 = vadd.f32 %v1170_v57, %v733_v35  ;;  %v762_v42 = vmax.f32 %v742_v37, 0.0 }
 0x1e0   : > { %v1397_v38 = vpop.f32.mrf.mxu1  ;;  %v1493_v58 = vld [vmem:[%s1688_s17 + $0x10] sm:$0xff] (%p851_p8)  }
 0x1e1   : > { %1280 = vst [vmem:[%s1688_s17 + $0x20] sm:$0xff] %v1260_v36   ;;  %v745_v40 = vadd.f32 %v1397_v38, %v1170_v57  ;;  %v760_v45 = vmax.f32 %v734_v39, 0.0 }
 0x1e2   : > { %v736_v41 = vpop.f32.mrf.mxu1 }
 0x1e3   : > { %v763_v43 = vmax.f32 %v745_v40, 0.0  ;;  %v737_v44 = vadd.f32 %v1170_v57, %v736_v41  ;;  %v1498_v57 = vld [vmem:[%s1755_s5 + $0x28] sm:$0xff] (%p851_p8)  }
 0x1e4   : > { %1423 = vmatpush3.bf16.msra.mxu1 (%p851_p8), %v1498_v57 }
 0x1e5   : > { %v1275_v46 = vpack.c.bf16 %v763_v43, %v762_v42  ;;  %v761_v47 = vmax.f32 %v737_v44, 0.0  ;;  %855 = sbr.rel (!%p851_p8) target bundleno = 1230 (0x4ce), region = 56  ;;  %1424 = vmatprep.subr.bf16.mxu1 (%p851_p8), %v1532_v50 }
 0x1e6   : > { %v1490_v52 = vld [vmem:[%s1688_s17 + $0x28] sm:$0xff] (%p851_p8)  }
 0x1e7   : > { %1283 = vst [vmem:[%s1688_s17 + $0x38] sm:$0xff] %v1275_v46   ;;  %v1270_v48 = vpack.c.bf16 %v761_v47, %v760_v45 }
 0x1e8   : > { %v1491_v54 = vld [vmem:[%s1688_s17 + $0x20] sm:$0xff] (%p851_p8)   ;;  %1425 = vmatpush3.bf16.msra.mxu1 (%p851_p8), %v1499_v59 }
 0x1e9   : > { %1282 = vst [vmem:[%s1688_s17 + $0x30] sm:$0xff] %v1270_v48   ;;  %1426 = vmatprep.subr.bf16.mxu1 (%p851_p8), %v1532_v50 }
 0x1ec   : > { %1427 = vmatpush3.bf16.msra.mxu1 %v1500_v61 }
 0x1ed   : > { %1428 = vmatprep.subr.bf16.mxu1 %v1532_v50 }
 0x1ee   : > { %v1488_v49 = vld [vmem:[%s1688_s17 + $0x38] sm:$0xff]  }
 0x1ef   : > { %1399 = vmatpush3.bf16.msra.mxu0 %v1488_v49 }
 0x1f0   : > { %v1489_v51 = vld [vmem:[%s1688_s17 + $0x30] sm:$0xff]   ;;  %1400 = vmatprep.subr.bf16.mxu0 %v1532_v50  ;;  %1429 = vmatpush3.bf16.msra.mxu1 %v1501_v63 }
 0x1f1   : > { %1430 = vmatprep.subr.bf16.mxu1 %v1532_v50 }
 0x1f3   : > { %1401 = vmatpush3.bf16.msra.mxu0 %v1489_v51 }
 0x1f4   : > { %1402 = vmatprep.subr.bf16.mxu0 %v1532_v50  ;;  %1431 = vmatpush3.bf16.msra.mxu1 %v1502_v1 }
 0x1f5   : > { %1432 = vmatprep.subr.bf16.mxu1 %v1532_v50 }
 0x1f7   : > { %1403 = vmatpush3.bf16.msra.mxu0 %v1490_v52 }
 0x1f8   : > { %1404 = vmatprep.subr.bf16.mxu0 %v1532_v50  ;;  %1433 = vmatpush3.bf16.msra.mxu1 %v1503_v2 }
 0x1fb   : > { %1405 = vmatpush3.bf16.msra.mxu0 %v1491_v54 }
 0x1fc   : > { %1406 = vmatprep.subr.bf16.mxu0 %v1532_v50 }
 0x1ff   : > { %1407 = vmatpush3.bf16.msra.mxu0 %v1492_v56 }
 0x200   : > { %1408 = vmatprep.subr.bf16.mxu0 %v1532_v50 }
 0x203   : > { %1409 = vmatpush3.bf16.msra.mxu0 %v1493_v58 }
 0x204   : > { %1410 = vmatprep.subr.bf16.mxu0 %v1532_v50 }
 0x207   : > { %1411 = vmatpush3.bf16.msra.mxu0 %v1494_v60 }
 0x208   : > { %1412 = vmatprep.subr.bf16.mxu0 %v1532_v50 }
 0x20b   : > { %1413 = vmatpush3.bf16.msra.mxu0 %v1495_v62 }
 0x20e   : > { %1415 = vmatmul.mubr.bf16.vlgmr.msra.gmra.mxu0 %v876_v0 }
 0x2ce   : > { %v959_v3 = vpop.f32.mrf.mxu0 }
 0x2cf   : > { %v965_v4 = vpack.c.bf16 %v959_v3, %v959_v3 }
 0x2d0   : > { %v1416_v5 = vpop.f32.mrf.mxu0 }
 0x2d1   : > { %1435 = vmatmul.mubr.bf16.vlgmr.msra.gmra.mxu1 %v965_v4 }
 0x2d2   : > { %v962_v6 = vpop.f32.mrf.mxu0 }
 0x2d4   : > { %v1417_v7 = vpop.f32.mrf.mxu0 }
 0x391   : > { %v1071_v11 = vpop.f32.mrf.mxu1 }
 0x392   : > { %v1072_v12 = vadd.f32 %v1207_v10, %v1071_v11 }
 0x393   : > { %v1436_v13 = vpop.f32.mrf.mxu1 }
 0x394   : > { %v1080_v14 = vsel %vm1079_vm1, %v1072_v12, -1e+30 }
 0x395   : > { %1081 = vmax.xlane.f32.xlu0 %v1080_v14  ;;  %v1074_v15 = vpop.f32.mrf.mxu1 }
 0x397   : > { %v1437_v16 = vpop.f32.mrf.mxu1 }
 0x41e   : > { %v1082_v17 = vpop.xlane.xlu0 %1081 }
 0x41f   : > { %v1083_v18 = vsub.f32 %v1080_v14, %v1082_v17 }
 0x421   : > { %v1084_v19 = vmul.f32 1.442695, %v1083_v18 }
 0x423   : > { %1504 = vpow2.f32 %v1084_v19 }
 0x430   : > { %v1505_v20 = vpop.eup %1504 }
 0x431   : > { %1086 = vadd.xlane.f32.xlu0 %v1505_v20 }
 0x4ba   : > { %v1087_v21 = vpop.xlane.xlu0 %1086 }
 0x4bb   : > { %1506 = vlog2.f32 %v1087_v21 }
 0x4c8   : > { %v1507_v22 = vpop.eup %1506 }
 0x4c9   : > { %v1089_v23 = vmul.f32 0.6931472, %v1507_v22 }
 0x4cb   : > { %v1090_v24 = vsub.f32 %v1083_v18, %v1089_v23 }
 0x4cd   : > { %1091 = vst [vmem:[%s1757_s7] sm:$0xff] %v1090_v24 }
 0x4ce PF: > { %s17_s26 = sadd.s32 1, %s1530_s26   ;;  %s1758_s24 = smov %s1526_s25 }
 0x4cf   : > { %p14_p9 = scmp.ge.s32.totalorder %s17_s26, 7   ;;  %s1759_s25 = smov %s1761_s27 }
 0x4d1   :  { %16 = sbr.rel (!%p14_p9) target bundleno = 2 (0x2), region = 88 }

</bundles_post_ra>
